<compile_context>
chip_gen: v7x
topology: tpu7x:2x2x1
jax: 0.10.0
libtpu: 0.0.40
codegen_flags: <defaults>
</compile_context>

<pallas_src>
import functools
import math

import numpy as np
import jax
import jax.numpy as jnp
from jax import lax
from jax.experimental import pallas as pl
from jax.experimental.pallas import tpu as pltpu

TAU_S = 5.0  # module "parameter" (tau_s from __init__); no learnable weights


def _decay_kernel_matrix(t_real, t_pad, tau_s):
    """(128,128) block-diagonal matrix M s.t. (packed x) @ M == packed PSP(x)."""
    decay = 1.0 - 1.0 / tau_s
    t = np.arange(t_pad)
    diff = t[:, None] - t[None, :]  # K[t, s]
    # Rows for padded output time steps (t >= t_real) are zeroed so padded steps
    # contribute nothing (outputs there are zero-padded too -> delta == 0).
    K = np.where(
        (diff >= 0) & (t[:, None] < t_real),
        decay ** np.maximum(diff, 0) / tau_s,
        0.0,
    )
    # Packed layout: each 128-lane row holds (128 // t_pad) neurons, each a contiguous
    # t_pad-long time segment -> block-diagonal repetition of K^T.
    M = np.kron(np.eye(128 // t_pad), K.T)
    return jnp.asarray(M, dtype=jnp.float32)


def _choose_tiling(rows, max_block_rows=8192, min_block_rows=1024):
    """Pick block_rows (multiple of 8 unless it equals `rows`).

    Small inputs -> one full-array block.  Larger inputs -> >= 2 blocks (megacore on
    v7x) of <= max_block_rows rows, preferring an exact divisor of `rows` (no partial
    last block); otherwise accept a partial last block which the kernel masks.  Never
    drops below ~1024 rows (~1 MiB/input/step) to stay at the HBM roofline.
    """
    if rows <= 2 * min_block_rows:
        return rows
    # Aim for ~half the rows per block (>= 2 blocks), capped at max_block_rows.
    target = min(max_block_rows, ((-(-rows // 2)) + 7) // 8 * 8)
    target = max(target, min_block_rows)
    for cand in range(target, min_block_rows - 1, -8):
        if rows % cand == 0:
            return cand
    return target  # partial last block -> in-kernel tail-row masking


def _make_loss_kernel(rows, block_rows, sub):
    needs_mask = (rows % block_rows) != 0  # static: only traced in if needed

    def kernel(out_ref, tgt_ref, kmat_ref, part_ref):
        # out_ref, tgt_ref : (block_rows, 128) blocks in native dtype
        # kmat_ref         : (128, 128) f32 decay-kernel matrix (constant)
        # part_ref         : (1, sub, 128) f32 per-block partial sums (lane dense)
        x = tgt_ref[...].astype(jnp.float32)
        o = out_ref[...].astype(jnp.float32)
        if needs_mask:
            # Partial last block: zero BOTH operands for tail rows so delta == 0
            # (garbage / stale VMEM beyond the array extent must not leak in).
            row_ids = lax.broadcasted_iota(jnp.int32, x.shape, 0)
            valid = (pl.program_id(0) * block_rows + row_ids) < rows
            x = jnp.where(valid, x, 0.0)
            o = jnp.where(valid, o, 0.0)
        # PSP of the whole block via the MXU.  HIGHEST keeps f32 accuracy; DEFAULT
        # (single bf16 pass) would fail the 1e-4 check.  Still well under the HBM
        # roofline on v6e/v7x and ~parity on v5e.
        psp = jnp.dot(
            x,
            kmat_ref[...],
            preferred_element_type=jnp.float32,
            precision=lax.Precision.HIGHEST,
        )
        delta = o - psp
        sq = delta * delta
        # Fold (block_rows, 128) -> (1, sub, 128) with pure vreg adds (no SMEM scalar
        # RMW, no cross-lane reduce on the critical path).
        part_ref[...] = jnp.sum(sq.reshape(-1, sub, 128), axis=0, keepdims=True)

    return kernel


@functools.partial(jax.jit, static_argnames=("tau_s", "max_block_rows"))
def spike_kernel_loss(outputs, target, tau_s=TAU_S, max_block_rows=8192):
    assert outputs.shape == target.shape
    t_real = outputs.shape[-1]
    # TODO(synk): T > 128 would need a tiled (multi-matmul) time kernel.
    assert 1 <= t_real <= 128
    n = math.prod(outputs.shape[:-1])

    # Pad the time axis up to the next power of two (divides 128).  Exact: decay-kernel
    # rows for padded steps are zero.  Only non-power-of-2 T pays this copy.
    t_pad = 1
    while t_pad < t_real:
        t_pad *= 2
    if t_pad != t_real:
        outputs = jnp.pad(outputs.reshape(n, t_real), ((0, 0), (0, t_pad - t_real)))
        target = jnp.pad(target.reshape(n, t_real), ((0, 0), (0, t_pad - t_real)))

    out_flat = outputs.reshape(-1)   # pure view of the native contiguous layout
    tgt_flat = target.reshape(-1)
    total = n * t_pad

    # Lane-align only if needed (rare); pad is whole zero neurons (t_pad | 128), exact.
    lane_pad = (-total) % 128
    if lane_pad:
        out_flat = jnp.pad(out_flat, (0, lane_pad))
        tgt_flat = jnp.pad(tgt_flat, (0, lane_pad))
        total += lane_pad

    rows = total // 128
    out2 = out_flat.reshape(rows, 128)
    tgt2 = tgt_flat.reshape(rows, 128)

    block_rows = _choose_tiling(rows, max_block_rows)
    num_blocks = -(-rows // block_rows)
    sub = 8 if block_rows % 8 == 0 else 1  # tiny single-block shapes fold to (1,1,128)

    kmat = _decay_kernel_matrix(t_real, t_pad, float(tau_s))

    bytes_accessed = (
        rows * 128 * (out2.dtype.itemsize + tgt2.dtype.itemsize)
        + kmat.size * 4
        + num_blocks * sub * 128 * 4
    )
    cost = pl.CostEstimate(
        flops=2 * rows * 128 * 128, transcendentals=0, bytes_accessed=bytes_accessed
    )

    partials = pl.pallas_call(
        _make_loss_kernel(rows, block_rows, sub),
        out_shape=jax.ShapeDtypeStruct((num_blocks, sub, 128), jnp.float32),
        grid=(num_blocks,),
        in_specs=[
            pl.BlockSpec((block_rows, 128), lambda i: (i, 0)),
            pl.BlockSpec((block_rows, 128), lambda i: (i, 0)),
            pl.BlockSpec((128, 128), lambda i: (0, 0)),
        ],
        out_specs=pl.BlockSpec((1, sub, 128), lambda i: (i, 0, 0)),
        compiler_params=pltpu.CompilerParams(
            # Independent per-block partials -> truly parallel grid (2 TCs on v7x).
            dimension_semantics=("parallel",),
            # 2 inputs x 2 buffers x 4 MiB (8192-row f32 blocks) + temps; fits v7x.
            vmem_limit_bytes=40 * 1024 * 1024,
        ),
        cost_estimate=cost,
    )(out2, tgt2, kmat)
    return 0.5 * jnp.sum(partials)


# ---------------- pure-JAX reference (mirrors the PyTorch module) ----------------
def _psp_ref(x, tau_s):
    xt = jnp.moveaxis(x, -1, 0)  # (T, ...)

    def step(syn, inp):
        syn = syn - syn / tau_s + inp
        return syn, syn / tau_s

    _, syns = lax.scan(step, jnp.zeros(xt.shape[1:], x.dtype), xt)
    return jnp.moveaxis(syns, 0, -1)


def spike_kernel_loss_ref(outputs, target, tau_s=TAU_S):
    delta = outputs - _psp_ref(target, tau_s)
    return 0.5 * jnp.sum(delta * delta)


if __name__ == "__main__":
    key = jax.random.PRNGKey(0)

    test_cases = [
        ((2, 4, 16, 8), jnp.float32),    # primary: aligned zero-copy path, single block
        ((3, 5, 7, 8), jnp.float32),     # lane-tail pad fallback (rare shape)
        ((2, 5, 6), jnp.float32),        # time padding (T=6 -> 8)
        ((8, 32, 130, 8), jnp.float32),  # 2-block parallel grid, exact-divisor tiling
        ((8, 4112, 8), jnp.float32),     # 2-block grid with in-kernel tail-row masking
        ((2, 4, 16, 8), jnp.bfloat16),   # bf16 spike target (0/1 exact): ~25% less HBM
    ]
    for idx, (shape, tgt_dtype) in enumerate(test_cases):
        k1, k2 = jax.random.split(jax.random.fold_in(key, idx))
        outputs = jax.random.normal(k1, shape, dtype=jnp.float32)
        target = jax.random.bernoulli(k2, 0.3, shape).astype(tgt_dtype)  # spike train
        loss = jax.block_until_ready(spike_kernel_loss(outputs, target))
        loss_ref = jax.block_until_ready(
            spike_kernel_loss_ref(outputs, target.astype(jnp.float32))
        )
        assert jnp.allclose(loss, loss_ref, rtol=2e-4, atol=1e-4), (
            shape, tgt_dtype, loss, loss_ref)
    print("KERNEL_OK")
</pallas_src>

<mosaic_0001>
module attributes {stable_mosaic.version = 11 : i64} {
  func.func @kernel(%arg0: i32, %arg1: memref<8x128xf32, #tpu.memory_space<vmem>>, %arg2: memref<8x128xf32, #tpu.memory_space<vmem>>, %arg3: memref<128x128xf32, #tpu.memory_space<vmem>>, %arg4: memref<1x8x128xf32, #tpu.memory_space<vmem>>) attributes {dimension_semantics = [#tpu.dimension_semantics<parallel>], iteration_bounds = array<i64: 1>, scalar_prefetch = 0 : i64, scratch_operands = 0 : i64, tpu.core_type = #tpu.core_type<tc>, window_params = [{transform_indices = @transform_0, window_bounds = array<i64: 8, 128>}, {transform_indices = @transform_1, window_bounds = array<i64: 8, 128>}, {pipeline_mode = #tpu.pipeline_mode<synchronous>, transform_indices = @transform_2, window_bounds = array<i64: 128, 128>}, {transform_indices = @transform_3, window_bounds = array<i64: 1, 8, 128>}]} {
    %c0 = arith.constant 0 : index
    %c0_0 = arith.constant 0 : index
    %0 = vector.load %arg2[%c0, %c0_0] : memref<8x128xf32, #tpu.memory_space<vmem>>, vector<8x128xf32>
    %c0_1 = arith.constant 0 : index
    %c0_2 = arith.constant 0 : index
    %1 = vector.load %arg1[%c0_1, %c0_2] : memref<8x128xf32, #tpu.memory_space<vmem>>, vector<8x128xf32>
    %c0_3 = arith.constant 0 : index
    %c0_4 = arith.constant 0 : index
    %2 = vector.load %arg3[%c0_3, %c0_4] : memref<128x128xf32, #tpu.memory_space<vmem>>, vector<128x128xf32>
    %cst = arith.constant dense<0.000000e+00> : vector<8x128xf32>
    %3 = tpu.matmul %0, %2, %cst {dimension_numbers = #tpu.dot_dimension_numbers<[1], [0], [0], [1], [0, 0, 1, 1], [], []>, precision = #tpu.contract_precision<fp32>} : vector<8x128xf32>, vector<128x128xf32>, vector<8x128xf32> -> vector<8x128xf32>
    %4 = arith.subf %1, %3 : vector<8x128xf32>
    %5 = arith.mulf %4, %4 : vector<8x128xf32>
    %6 = vector.shape_cast %5 : vector<8x128xf32> to vector<1x8x128xf32>
    %cst_5 = arith.constant dense<0.000000e+00> : vector<8x128xf32>
    %7 = vector.multi_reduction <add>, %6, %cst_5 [0] : vector<1x8x128xf32> to vector<8x128xf32>
    %8 = vector.shape_cast %7 : vector<8x128xf32> to vector<1x8x128xf32>
    %c0_6 = arith.constant 0 : index
    %c0_7 = arith.constant 0 : index
    %c0_8 = arith.constant 0 : index
    %9 = vector.load %arg4[%c0_6, %c0_7, %c0_8] : memref<1x8x128xf32, #tpu.memory_space<vmem>>, vector<1x8x128xf32>
    tpu.vector_store %arg4[%c0_6, %c0_7, %c0_8], %8 {strides = array<i32>} : memref<1x8x128xf32, #tpu.memory_space<vmem>>, vector<1x8x128xf32>,
    return
  }
  func.func @transform_0(%arg0: i32) -> (i32, i32) {
    %c0_i32 = arith.constant 0 : i32
    %c0_i32_0 = arith.constant 0 : i32
    return %arg0, %c0_i32 : i32, i32
  }
  func.func @transform_1(%arg0: i32) -> (i32, i32) {
    %c0_i32 = arith.constant 0 : i32
    %c0_i32_0 = arith.constant 0 : i32
    return %arg0, %c0_i32 : i32, i32
  }
  func.func @transform_2(%arg0: i32) -> (i32, i32) {
    %c0_i32 = arith.constant 0 : i32
    %c0_i32_0 = arith.constant 0 : i32
    %c0_i32_1 = arith.constant 0 : i32
    return %c0_i32, %c0_i32_0 : i32, i32
  }
  func.func @transform_3(%arg0: i32) -> (i32, i32, i32) {
    %c0_i32 = arith.constant 0 : i32
    %c0_i32_0 = arith.constant 0 : i32
    %c0_i32_1 = arith.constant 0 : i32
    return %arg0, %c0_i32, %c0_i32_0 : i32, i32, i32
  }
}

</mosaic_0001>

<bundles_post_ra>
// kernel: spike_kernel_loss.1
= control target key start
LH: loop header
LB: loop body
LE: loop exit
PB: predicated region body
PF: predicated region fallthrough
CT: control target
= control target key end

     0   :  { %v1149_v0 = vmov 0.0|0.0   ;;  %vm1150_vm0 = vmmov 0   ;;  %v1151_v8 = vmov 0.0   ;;  %s1476_s2 = inlined_call_operand.vmem [shape: f32[128,128], index: 2, kind: input, shape index: {}]   ;;  %s1477_s1 = inlined_call_operand.vmem [shape: f32[8,128], index: 1, kind: input, shape index: {}]   ;;  %s1478_s0 = inlined_call_operand.vmem [shape: f32[8,128], index: 0, kind: input, shape index: {}]   ;;  %s1479_s3 = inlined_call_operand.vmem [shape: f32[1,8,128], index: 3, kind: output, shape index: {}]  }
   0x1   :  { %993 = vmatprep.subr.bf16.mxu1 %v1149_v0  ;;  %1065 = vmatprep.subr.bf16.mxu0 %v1149_v0  ;;  %v16_v1 = vld [vmem:[%s1476_s2] sm:$0xff]  ;;  %v17_v2 = vld [vmem:[%s1476_s2 + $0x8] sm:$0xff]  ;;  %v18_v3 = vld [vmem:[%s1476_s2 + $0x10] sm:$0xff] }
   0x2   :  { %v33_v4 = vand.u32 4294901760, %v16_v1  ;;  %v36_v5 = vand.u32 4294901760, %v17_v2  ;;  %v19_v6 = vld [vmem:[%s1476_s2 + $0x18] sm:$0xff]  ;;  %v39_v7 = vand.u32 4294901760, %v18_v3  ;;  %815 = vmatprep.mubr.msk.f32.mxu1 %vm1150_vm0, %v1151_v8  ;;  %920 = vmatprep.mubr.msk.f32.mxu0 %vm1150_vm0, %v1151_v8  ;;  %v20_v10 = vld [vmem:[%s1476_s2 + $0x20] sm:$0xff]  ;;  %v21_v11 = vld [vmem:[%s1476_s2 + $0x28] sm:$0xff] }
   0x3   :  { %v42_v9 = vand.u32 4294901760, %v19_v6  ;;  %v45_v14 = vand.u32 4294901760, %v20_v10  ;;  %v48_v15 = vand.u32 4294901760, %v21_v11  ;;  %v22_v16 = vld [vmem:[%s1476_s2 + $0x30] sm:$0xff]  ;;  %v23_v17 = vld [vmem:[%s1476_s2 + $0x38] sm:$0xff]  ;;  %v1219_v21 = vld [vmem:[%s1476_s2 + $0x40] sm:$0xff] }
   0x4   :  { %v1196_v12 = vpack.c.bf16 %v36_v5, %v33_v4  ;;  %v51_v19 = vand.u32 4294901760, %v22_v16  ;;  %v54_v20 = vand.u32 4294901760, %v23_v17  ;;  %v1224_v22 = vld [vmem:[%s1476_s2 + $0x48] sm:$0xff]  ;;  %v57_v24 = vand.u32 4294901760, %v1219_v21  ;;  %v14_v26 = vld [vmem:[%s1477_s1] sm:$0xff]  ;;  %v1240_v27 = vld [vmem:[%s1476_s2 + $0x50] sm:$0xff] }
   0x5   :  { %v1200_v13 = vpack.c.bf16 %v42_v9, %v39_v7  ;;  %v1212_v18 = vpack.c.bf16 %v48_v15, %v45_v14  ;;  %v60_v25 = vand.u32 4294901760, %v1224_v22  ;;  %v1245_v28 = vld [vmem:[%s1476_s2 + $0x58] sm:$0xff]  ;;  %v1247_v29 = vsub.f32 %v16_v1, %v33_v4  ;;  %v1262_v35 = vld [vmem:[%s1476_s2 + $0x60] sm:$0xff]  ;;  %v1269_v36 = vld [vmem:[%s1476_s2 + $0x68] sm:$0xff] }
   0x6   :  { %995 = vmatpush3.bf16.msra.mxu1 %v1196_v12  ;;  %1067 = vmatpush3.bf16.msra.mxu0 %v1196_v12  ;;  %v1228_v23 = vpack.c.bf16 %v54_v20, %v51_v19  ;;  %v1249_v30 = vand.u32 4294901760, %v14_v26  ;;  %v1251_v31 = vsub.f32 %v17_v2, %v36_v5  ;;  %v63_v33 = vand.u32 4294901760, %v1240_v27  ;;  %v1291_v43 = vld [vmem:[%s1476_s2 + $0x70] sm:$0xff]  ;;  %v1296_v44 = vld [vmem:[%s1476_s2 + $0x78] sm:$0xff] }
   0x7   :  { %996 = vmatprep.subr.bf16.mxu1 %v1149_v0  ;;  %1068 = vmatprep.subr.bf16.mxu0 %v1149_v0  ;;  %v1255_v32 = vpack.c.bf16 %v60_v25, %v57_v24  ;;  %v66_v34 = vand.u32 4294901760, %v1245_v28  ;;  %v1271_v37 = vsub.f32 %v18_v3, %v39_v7  ;;  %v1273_v38 = vsub.f32 %v19_v6, %v42_v9 }
   0x8   :  { %v69_v39 = vand.u32 4294901760, %v1262_v35  ;;  %v1277_v40 = vsub.f32 %v14_v26, %v1249_v30  ;;  %v72_v42 = vand.u32 4294901760, %v1269_v36  ;;  %v126_v45 = vand.u32 4294901760, %v1247_v29 }
   0x9   :  { %v1285_v41 = vpack.c.bf16 %v66_v34, %v63_v33  ;;  %v133_v46 = vand.u32 4294901760, %v1251_v31  ;;  %v1302_v47 = vsub.f32 %v20_v10, %v45_v14  ;;  %v1304_v48 = vsub.f32 %v21_v11, %v48_v15 }
   0xa   :  { %998 = vmatpush3.bf16.msra.mxu1 %v1200_v13  ;;  %1070 = vmatpush3.bf16.msra.mxu0 %v1200_v13  ;;  %v75_v49 = vand.u32 4294901760, %v1291_v43  ;;  %v78_v50 = vand.u32 4294901760, %v1296_v44  ;;  %v115_v51 = vand.u32 4294901760, %v1277_v40  ;;  %v140_v52 = vand.u32 4294901760, %v1271_v37 }
   0xb   :  { %999 = vmatprep.subr.bf16.mxu1 %v1149_v0  ;;  %1071 = vmatprep.subr.bf16.mxu0 %v1149_v0  ;;  %v1316_v53 = vpack.c.bf16 %v72_v42, %v69_v39  ;;  %v127_v54 = vsub.f32 %v1247_v29, %v126_v45  ;;  %v134_v55 = vsub.f32 %v1251_v31, %v133_v46  ;;  %v147_v56 = vand.u32 4294901760, %v1273_v38 }
   0xc   :  { %v1323_v57 = vsub.f32 %v22_v16, %v51_v19  ;;  %v1325_v58 = vsub.f32 %v23_v17, %v54_v20  ;;  %v116_v59 = vsub.f32 %v1277_v40, %v115_v51  ;;  %v141_v60 = vsub.f32 %v1271_v37, %v140_v52 }
   0xd   :  { %v154_v61 = vand.u32 4294901760, %v1302_v47  ;;  %v161_v62 = vand.u32 4294901760, %v1304_v48  ;;  %v1337_v63 = vpack.c.bf16 %v78_v50, %v75_v49  ;;  %v128_v1 = vand.u32 4294901760, %v127_v54 }
   0xe   :  { %1001 = vmatpush3.bf16.msra.mxu1 %v1212_v18  ;;  %1073 = vmatpush3.bf16.msra.mxu0 %v1212_v18  ;;  %v135_v2 = vand.u32 4294901760, %v134_v55  ;;  %v148_v3 = vsub.f32 %v1273_v38, %v147_v56  ;;  %v1343_v4 = vsub.f32 %v1219_v21, %v57_v24  ;;  %v1346_v5 = vsub.f32 %v1224_v22, %v60_v25 }
   0xf   :  { %1002 = vmatprep.subr.bf16.mxu1 %v1149_v0  ;;  %1074 = vmatprep.subr.bf16.mxu0 %v1149_v0  ;;  %v1090_v6 = vpack.c.bf16 %v133_v46, %v126_v45  ;;  %v117_v7 = vand.u32 4294901760, %v116_v59  ;;  %v142_v9 = vand.u32 4294901760, %v141_v60  ;;  %v155_v10 = vsub.f32 %v1302_v47, %v154_v61 }
  0x10   :  { %v162_v11 = vsub.f32 %v1304_v48, %v161_v62  ;;  %v1018_v14 = vpack.c.bf16 %v135_v2, %v128_v1  ;;  %v149_v15 = vand.u32 4294901760, %v148_v3  ;;  %v168_v16 = vand.u32 4294901760, %v1323_v57 }
  0x11   :  { %v175_v17 = vand.u32 4294901760, %v1325_v58  ;;  %v1359_v19 = vsub.f32 %v1240_v27, %v63_v33  ;;  %v1364_v20 = vsub.f32 %v1245_v28, %v66_v34  ;;  %v1093_v21 = vpack.c.bf16 %v147_v56, %v140_v52 }
  0x12   :  { %1004 = vmatpush3.bf16.msra.mxu1 %v1228_v23  ;;  %1076 = vmatpush3.bf16.msra.mxu0 %v1228_v23  ;;  %v156_v22 = vand.u32 4294901760, %v155_v10  ;;  %v163_v24 = vand.u32 4294901760, %v162_v11  ;;  %v182_v25 = vand.u32 4294901760, %v1343_v4  ;;  %v1021_v26 = vpack.c.bf16 %v149_v15, %v142_v9 }
  0x13   :  { %1005 = vmatprep.subr.bf16.mxu1 %v1149_v0  ;;  %1077 = vmatprep.subr.bf16.mxu0 %v1149_v0  ;;  %v169_v45 = vsub.f32 %v1323_v57, %v168_v16  ;;  %v176_v27 = vsub.f32 %v1325_v58, %v175_v17  ;;  %v189_v33 = vand.u32 4294901760, %v1346_v5  ;;  %v1375_v28 = vsub.f32 %v1262_v35, %v69_v39 }
  0x14   :  { %v1380_v34 = vsub.f32 %v1269_v36, %v72_v42  ;;  %v1024_v46 = vpack.c.bf16 %v163_v24, %v156_v22  ;;  %v183_v52 = vsub.f32 %v1343_v4, %v182_v25  ;;  %v196_v54 = vand.u32 4294901760, %v1359_v19 }
  0x15   :  { %v170_v35 = vand.u32 4294901760, %v169_v45  ;;  %v177_v39 = vand.u32 4294901760, %v176_v27  ;;  %v190_v55 = vsub.f32 %v1346_v5, %v189_v33  ;;  %v203_v36 = vand.u32 4294901760, %v1364_v20 }
  0x16   :  { %1007 = vmatpush3.bf16.msra.mxu1 %v1255_v32  ;;  %1079 = vmatpush3.bf16.msra.mxu0 %v1255_v32  ;;  %v1395_v42 = vsub.f32 %v1291_v43, %v75_v49  ;;  %v1400_v56 = vsub.f32 %v1296_v44, %v78_v50  ;;  %v1099_v59 = vpack.c.bf16 %v175_v17, %v168_v16  ;;  %v184_v60 = vand.u32 4294901760, %v183_v52 }
  0x17   :  { %1008 = vmatprep.subr.bf16.mxu1 %v1149_v0  ;;  %1080 = vmatprep.subr.bf16.mxu0 %v1149_v0  ;;  %v1027_v1 = vpack.c.bf16 %v177_v39, %v170_v35  ;;  %v191_v2 = vand.u32 4294901760, %v190_v55  ;;  %v204_v3 = vsub.f32 %v1364_v20, %v203_v36  ;;  %v217_v43 = vand.u32 4294901760, %v1380_v34 }
  0x18   :  { %v1102_v44 = vpack.c.bf16 %v189_v33, %v182_v25  ;;  %v231_v11 = vand.u32 4294901760, %v1400_v56 }
  0x19   :  { %v205_v9 = vand.u32 4294901760, %v204_v3  ;;  %v218_v10 = vsub.f32 %v1380_v34, %v217_v43 }
  0x1a   :  { %1010 = vmatpush3.bf16.msra.mxu1 %v1285_v41  ;;  %1082 = vmatpush3.bf16.msra.mxu0 %v1285_v41  ;;  %v232_v22 = vsub.f32 %v1400_v56, %v231_v11 }
  0x1b   :  { %1011 = vmatprep.subr.bf16.mxu1 %v1149_v0  ;;  %1083 = vmatprep.subr.bf16.mxu0 %v1149_v0  ;;  %v219_v17 = vand.u32 4294901760, %v218_v10 }
  0x1c   :  { %v233_v45 = vand.u32 4294901760, %v232_v22 }
  0x1e   :  { %1013 = vmatpush3.bf16.msra.mxu1 %v1316_v53  ;;  %1085 = vmatpush3.bf16.msra.mxu0 %v1316_v53 }
  0x1f   :  { %1014 = vmatprep.subr.bf16.mxu1 %v1149_v0  ;;  %1086 = vmatprep.subr.bf16.mxu0 %v1149_v0 }
  0x22   :  { %1016 = vmatpush3.bf16.msra.mxu1 %v1337_v63  ;;  %1088 = vmatpush3.bf16.msra.mxu0 %v1337_v63 }
  0x23   :  { %1017 = vmatprep.subr.bf16.mxu1 %v1149_v0  ;;  %1089 = vmatprep.subr.bf16.mxu0 %v1149_v0 }
  0x25   :  { %816 = vmatmul.mubr.f32.vlgmr.msra.gmra.mrb[0].mxu1 %v117_v7  ;;  %921 = vmatmul.mubr.f32.vlgmr.msra.gmra.mrb[0].mxu0 %v115_v51  ;;  %v1096_v51 = vpack.c.bf16 %v161_v62, %v154_v61  ;;  %v197_v61 = vsub.f32 %v1359_v19, %v196_v54  ;;  %v210_v62 = vand.u32 4294901760, %v1375_v28  ;;  %v1030_v7 = vpack.c.bf16 %v191_v2, %v184_v60 }
  0x26   :  { %1019 = vmatpush3.bf16.msra.mxu1 %v1018_v14  ;;  %1091 = vmatpush3.bf16.msra.mxu0 %v1090_v6  ;;  %v224_v6 = vand.u32 4294901760, %v1395_v42  ;;  %v1105_v14 = vpack.c.bf16 %v203_v36, %v196_v54 }
  0x27   :  { %1020 = vmatprep.subr.bf16.mxu1 %v1149_v0  ;;  %1092 = vmatprep.subr.bf16.mxu0 %v1149_v0  ;;  %v198_v49 = vand.u32 4294901760, %v197_v61  ;;  %v211_v50 = vsub.f32 %v1375_v28, %v210_v62  ;;  %v1108_v25 = vpack.c.bf16 %v217_v43, %v210_v62 }
  0x28   :  { %850 = vmatprep.mubr.msk.f32.mxu1 %vm1150_vm0, %v1151_v8  ;;  %955 = vmatprep.mubr.msk.f32.mxu0 %vm1150_vm0, %v1151_v8  ;;  %v1111_v33 = vpack.c.bf16 %v231_v11, %v224_v6 }
  0x29   :  { %v212_v15 = vand.u32 4294901760, %v211_v50  ;;  %v1033_v16 = vpack.c.bf16 %v205_v9, %v198_v49 }
  0x2a   :  { %1022 = vmatpush3.bf16.msra.mxu1 %v1021_v26  ;;  %1094 = vmatpush3.bf16.msra.mxu0 %v1093_v21  ;;  %v225_v21 = vsub.f32 %v1395_v42, %v224_v6 }
  0x2b   :  { %1023 = vmatprep.subr.bf16.mxu1 %v1149_v0  ;;  %1095 = vmatprep.subr.bf16.mxu0 %v1149_v0  ;;  %v1036_v24 = vpack.c.bf16 %v219_v17, %v212_v15 }
  0x2c   :  { %v226_v26 = vand.u32 4294901760, %v225_v21 }
  0x2e   :  { %1025 = vmatpush3.bf16.msra.mxu1 %v1024_v46  ;;  %1097 = vmatpush3.bf16.msra.mxu0 %v1096_v51  ;;  %v1039_v27 = vpack.c.bf16 %v233_v45, %v226_v26  ;;  %v1042_v46 = vpack.c.bf16 %v1251_v31, %v1247_v29  ;;  %v1045_v51 = vpack.c.bf16 %v1273_v38, %v1271_v37 }
  0x2f   :  { %1026 = vmatprep.subr.bf16.mxu1 %v1149_v0  ;;  %1098 = vmatprep.subr.bf16.mxu0 %v1149_v0  ;;  %v1048_v29 = vpack.c.bf16 %v1304_v48, %v1302_v47 }
  0x32   :  { %1028 = vmatpush3.bf16.msra.mxu1 %v1027_v1  ;;  %1100 = vmatpush3.bf16.msra.mxu0 %v1099_v59 }
  0x33   :  { %1029 = vmatprep.subr.bf16.mxu1 %v1149_v0  ;;  %1101 = vmatprep.subr.bf16.mxu0 %v1149_v0 }
  0x36   :  { %1031 = vmatpush3.bf16.msra.mxu1 %v1030_v7  ;;  %1103 = vmatpush3.bf16.msra.mxu0 %v1102_v44 }
  0x37   :  { %1032 = vmatprep.subr.bf16.mxu1 %v1149_v0  ;;  %1104 = vmatprep.subr.bf16.mxu0 %v1149_v0 }
  0x3a   :  { %1034 = vmatpush3.bf16.msra.mxu1 %v1033_v16  ;;  %1106 = vmatpush3.bf16.msra.mxu0 %v1105_v14 }
  0x3b   :  { %1035 = vmatprep.subr.bf16.mxu1 %v1149_v0  ;;  %1107 = vmatprep.subr.bf16.mxu0 %v1149_v0 }
  0x3e   :  { %1037 = vmatpush3.bf16.msra.mxu1 %v1036_v24  ;;  %1109 = vmatpush3.bf16.msra.mxu0 %v1108_v25 }
  0x3f   :  { %1038 = vmatprep.subr.bf16.mxu1 %v1149_v0  ;;  %1110 = vmatprep.subr.bf16.mxu0 %v1149_v0 }
  0x42   :  { %1040 = vmatpush3.bf16.msra.mxu1 %v1039_v27  ;;  %1112 = vmatpush3.bf16.msra.mxu0 %v1111_v33 }
  0x43   :  { %1041 = vmatprep.subr.bf16.mxu1 %v1149_v0  ;;  %1113 = vmatprep.subr.bf16.mxu0 %v1149_v0 }
  0x45   :  { %851 = vmatmul.mubr.f32.vlgmr.msra.gmra.mrb[0].mxu1 %v1249_v30  ;;  %956 = vmatmul.mubr.f32.vlgmr.msra.gmra.mrb[0].mxu0 %v1249_v30 }
  0x46   :  { %1043 = vmatpush3.bf16.msra.mxu1 %v1042_v46  ;;  %1115 = vmatpush3.bf16.msra.mxu0 %v1196_v12  ;;  %v1051_v12 = vpack.c.bf16 %v1325_v58, %v1323_v57 }
  0x47   :  { %1044 = vmatprep.subr.bf16.mxu1 %v1149_v0  ;;  %1116 = vmatprep.subr.bf16.mxu0 %v1149_v0 }
  0x48   :  { %885 = vmatprep.mubr.msk.f32.mxu1 %vm1150_vm0, %v1151_v8  ;;  %990 = vmatprep.mubr.msk.f32.mxu0 %vm1150_vm0, %v1151_v8  ;;  %v1054_v8 = vpack.c.bf16 %v1346_v5, %v1343_v4 }
  0x4a   :  { %1046 = vmatpush3.bf16.msra.mxu1 %v1045_v51  ;;  %1118 = vmatpush3.bf16.msra.mxu0 %v1200_v13  ;;  %v1057_v13 = vpack.c.bf16 %v1364_v20, %v1359_v19 }
  0x4b   :  { %1047 = vmatprep.subr.bf16.mxu1 %v1149_v0  ;;  %1119 = vmatprep.subr.bf16.mxu0 %v1149_v0 }
  0x4e   :  { %1049 = vmatpush3.bf16.msra.mxu1 %v1048_v29  ;;  %1121 = vmatpush3.bf16.msra.mxu0 %v1212_v18  ;;  %v1060_v18 = vpack.c.bf16 %v1380_v34, %v1375_v28 }
  0x4f   :  { %1050 = vmatprep.subr.bf16.mxu1 %v1149_v0  ;;  %1122 = vmatprep.subr.bf16.mxu0 %v1149_v0 }
  0x52   :  { %1052 = vmatpush3.bf16.msra.mxu1 %v1051_v12  ;;  %1124 = vmatpush3.bf16.msra.mxu0 %v1228_v23  ;;  %v1063_v23 = vpack.c.bf16 %v1400_v56, %v1395_v42 }
  0x53   :  { %1053 = vmatprep.subr.bf16.mxu1 %v1149_v0  ;;  %1125 = vmatprep.subr.bf16.mxu0 %v1149_v0 }
  0x56   :  { %1055 = vmatpush3.bf16.msra.mxu1 %v1054_v8  ;;  %1127 = vmatpush3.bf16.msra.mxu0 %v1255_v32  ;;  %v15_v32 = vld [vmem:[%s1478_s0] sm:$0xff] }
  0x57   :  { %1056 = vmatprep.subr.bf16.mxu1 %v1149_v0  ;;  %1128 = vmatprep.subr.bf16.mxu0 %v1149_v0 }
  0x5a   :  { %1058 = vmatpush3.bf16.msra.mxu1 %v1057_v13  ;;  %1130 = vmatpush3.bf16.msra.mxu0 %v1285_v41 }
  0x5b   :  { %1059 = vmatprep.subr.bf16.mxu1 %v1149_v0  ;;  %1131 = vmatprep.subr.bf16.mxu0 %v1149_v0 }
  0x5e   :  { %1061 = vmatpush3.bf16.msra.mxu1 %v1060_v18  ;;  %1133 = vmatpush3.bf16.msra.mxu0 %v1316_v53 }
  0x5f   :  { %1062 = vmatprep.subr.bf16.mxu1 %v1149_v0  ;;  %1134 = vmatprep.subr.bf16.mxu0 %v1149_v0 }
  0x62   :  { %1064 = vmatpush3.bf16.msra.mxu1 %v1063_v23  ;;  %1136 = vmatpush3.bf16.msra.mxu0 %v1337_v63 }
  0x65   :  { %886 = vmatmul.mubr.f32.vlgmr.msra.gmra.mrb[0].mxu1 %v1277_v40  ;;  %991 = vmatmul.mubr.f32.vlgmr.msra.gmra.mrb[0].mxu0 %v1249_v30 }
 0x138   :  { %v374_v31 = vpop.f32.mrb[0].mxu1  ;;  %v669_v37 = vpop.f32.mrb[0].mxu0 }
 0x139   :  { %v1137_v38 = vadd.f32 %v669_v37, %v374_v31  ;;  %v887_v41 = vpop.f32.mrb[1].mxu1  ;;  %v992_v47 = vpop.f32.mrb[1].mxu0 }
 0x13b   :  { %v673_v48 = vsub.f32 %v15_v32, %v1137_v38 }
 0x13d   :  { %v674_v53 = vmul.f32 %v673_v48, %v673_v48 }
 0x13f   :  { %676 = vst [vmem:[%s1479_s3] sm:$0xff] %v674_v53 }

</bundles_post_ra>
